<compile_context>
chip_gen: v7x
topology: tpu7x:2x2x1
jax: 0.10.0
libtpu: 0.0.40
codegen_flags: <defaults>
</compile_context>

<pallas_src>
import jax
import jax.numpy as jnp
from jax.experimental import pallas as pl
from jax.experimental.pallas import tpu as pltpu


def mnist_kernel(x_ref, w1_ref, b1_ref, w2_ref, b2_ref, out_ref):
    # x_ref:  (TB, 784) f32      w1_ref: (784, 28) f32    b1_ref: (1, 28) f32
    # w2_ref: (28, 10)  f32      b2_ref: (1, 10)   f32    out_ref: (TB, 10) f32

    # In-kernel bf16 cast for the MXU (hidden under the dominant x DMA).
    x = x_ref[...].astype(jnp.bfloat16)
    w1 = w1_ref[...].astype(jnp.bfloat16)

    # fc1 (bf16 x bf16 -> f32 accumulate on MXU) + bias + ReLU in f32
    h = jnp.dot(x, w1, preferred_element_type=jnp.float32) + b1_ref[...]
    h = jnp.maximum(h, 0.0)

    # fc2 in f32 (tiny weights; keeps precision of the post-ReLU activations)
    logits = jnp.dot(h, w2_ref[...], preferred_element_type=jnp.float32) + b2_ref[...]

    # Numerically stable log_softmax along the true 10-column extent.
    m = jnp.max(logits, axis=-1, keepdims=True)
    shifted = logits - m
    lse = jnp.log(jnp.sum(jnp.exp(shifted), axis=-1, keepdims=True))
    out_ref[...] = shifted - lse


def mnist_forward(x_nchw, w1, b1, w2, b2, *, block_b=2048):
    """x_nchw: (B, 1, 28, 28) float32 -> (B, 10) float32 log-probabilities."""
    B = x_nchw.shape[0]
    x = x_nchw.reshape(B, 1 * 28 * 28).astype(jnp.float32)  # matches torch .view

    w1_f = w1.astype(jnp.float32)
    b1_2d = b1.reshape(1, -1).astype(jnp.float32)
    w2_f = w2.astype(jnp.float32)
    b2_2d = b2.reshape(1, -1).astype(jnp.float32)

    # Batch tile: full array if it fits in one tile (any size is legal when the
    # block equals the full dim), otherwise a multiple of 8 (f32 sublane tile).
    if B <= block_b:
        TB = B
    else:
        TB = max(8, (block_b // 8) * 8)
    grid = (pl.cdiv(B, TB),)  # ragged last block masked by Pallas; rows independent

    weight_bytes = 4 * (w1_f.size + b1_2d.size + w2_f.size + b2_2d.size)
    cost = pl.CostEstimate(
        flops=2 * B * (784 * 28 + 28 * 10),
        transcendentals=B * 10,                       # exp in log_softmax
        bytes_accessed=B * 784 * 4 + B * 10 * 4 + weight_bytes,
    )

    out = pl.pallas_call(
        mnist_kernel,
        out_shape=jax.ShapeDtypeStruct((B, 10), jnp.float32),
        grid=grid,
        in_specs=[
            pl.BlockSpec((TB, 784), lambda i: (i, 0)),   # x: batch-tiled, pipelined
            pl.BlockSpec((784, 28), lambda i: (0, 0)),   # w1: VMEM-resident
            pl.BlockSpec((1, 28), lambda i: (0, 0)),     # b1
            pl.BlockSpec((28, 10), lambda i: (0, 0)),    # w2
            pl.BlockSpec((1, 10), lambda i: (0, 0)),     # b2
        ],
        out_specs=pl.BlockSpec((TB, 10), lambda i: (i, 0)),
        compiler_params=pltpu.CompilerParams(
            dimension_semantics=("parallel",),           # shard batch across TCs (v7x)
            vmem_limit_bytes=32 * 1024 * 1024,           # explicit, covers TB=2048 f32 on all gens
        ),
        cost_estimate=cost,
    )(x, w1_f, b1_2d, w2_f, b2_2d)
    return out


def init_params(key):
    """Deterministic init mirroring nn.Linear shapes (stored transposed):
    fc1: (784, 28), fc2: (28, 10), PyTorch-style uniform(-1/sqrt(fan_in), ...)."""
    k1, k2, k3, k4 = jax.random.split(key, 4)
    lim1 = 1.0 / jnp.sqrt(784.0)
    lim2 = 1.0 / jnp.sqrt(28.0)
    w1 = jax.random.uniform(k1, (784, 28), jnp.float32, -lim1, lim1)
    b1 = jax.random.uniform(k2, (28,), jnp.float32, -lim1, lim1)
    w2 = jax.random.uniform(k3, (28, 10), jnp.float32, -lim2, lim2)
    b2 = jax.random.uniform(k4, (10,), jnp.float32, -lim2, lim2)
    return w1, b1, w2, b2


def _reference(x_nchw, w1, b1, w2, b2):
    B = x_nchw.shape[0]
    xf = x_nchw.reshape(B, 784).astype(jnp.bfloat16).astype(jnp.float32)
    w1f = w1.astype(jnp.bfloat16).astype(jnp.float32)
    return jax.nn.log_softmax(jnp.maximum(xf @ w1f + b1, 0.0) @ w2 + b2, axis=-1)


if __name__ == "__main__":
    key = jax.random.PRNGKey(0)
    kx, kp = jax.random.split(key)
    w1, b1, w2, b2 = init_params(kp)

    # Small batch; spatial must be 28x28 because fc1 expects 784 features.
    B = 2
    x = jax.random.normal(kx, (B, 1, 28, 28), jnp.float32)
    out = jax.block_until_ready(mnist_forward(x, w1, b1, w2, b2))
    ref = _reference(x, w1, b1, w2, b2)
    assert out.shape == (B, 10)
    assert jnp.allclose(out, ref, atol=1e-4, rtol=1e-4), "mismatch vs reference (B=2)"

    # Also exercise the multi-tile + ragged-last-block path (TB=8, B=19 -> 3 steps).
    B2 = 19
    x2 = jax.random.normal(jax.random.PRNGKey(1), (B2, 1, 28, 28), jnp.float32)
    out2 = jax.block_until_ready(mnist_forward(x2, w1, b1, w2, b2, block_b=8))
    ref2 = _reference(x2, w1, b1, w2, b2)
    assert out2.shape == (B2, 10)
    assert jnp.allclose(out2, ref2, atol=1e-4, rtol=1e-4), "mismatch vs reference (ragged)"

    print("KERNEL_OK")
</pallas_src>

<mosaic_0001>
module attributes {stable_mosaic.version = 11 : i64} {
  func.func @mnist_kernel(%arg0: i32, %arg1: memref<2x784xf32, #tpu.memory_space<vmem>>, %arg2: memref<784x28xf32, #tpu.memory_space<vmem>>, %arg3: memref<1x28xf32, #tpu.memory_space<vmem>>, %arg4: memref<28x10xf32, #tpu.memory_space<vmem>>, %arg5: memref<1x10xf32, #tpu.memory_space<vmem>>, %arg6: memref<2x10xf32, #tpu.memory_space<vmem>>) attributes {dimension_semantics = [#tpu.dimension_semantics<parallel>], iteration_bounds = array<i64: 1>, scalar_prefetch = 0 : i64, scratch_operands = 0 : i64, tpu.core_type = #tpu.core_type<tc>, window_params = [{transform_indices = @transform_0, window_bounds = array<i64: 2, 784>}, {pipeline_mode = #tpu.pipeline_mode<synchronous>, transform_indices = @transform_1, window_bounds = array<i64: 784, 28>}, {pipeline_mode = #tpu.pipeline_mode<synchronous>, transform_indices = @transform_2, window_bounds = array<i64: 1, 28>}, {pipeline_mode = #tpu.pipeline_mode<synchronous>, transform_indices = @transform_3, window_bounds = array<i64: 28, 10>}, {pipeline_mode = #tpu.pipeline_mode<synchronous>, transform_indices = @transform_4, window_bounds = array<i64: 1, 10>}, {transform_indices = @transform_5, window_bounds = array<i64: 2, 10>}]} {
    %c0 = arith.constant 0 : index
    %c0_0 = arith.constant 0 : index
    %0 = vector.load %arg1[%c0, %c0_0] : memref<2x784xf32, #tpu.memory_space<vmem>>, vector<2x784xf32>
    %1 = arith.truncf %0 : vector<2x784xf32> to vector<2x784xbf16>
    %c0_1 = arith.constant 0 : index
    %c0_2 = arith.constant 0 : index
    %2 = vector.load %arg2[%c0_1, %c0_2] : memref<784x28xf32, #tpu.memory_space<vmem>>, vector<784x28xf32>
    %3 = arith.truncf %2 : vector<784x28xf32> to vector<784x28xbf16>
    %cst = arith.constant dense<0.000000e+00> : vector<2x28xf32>
    %4 = tpu.matmul %1, %3, %cst {dimension_numbers = #tpu.dot_dimension_numbers<[1], [0], [0], [1], [0, 0, 1, 1], [], []>} : vector<2x784xbf16>, vector<784x28xbf16>, vector<2x28xf32> -> vector<2x28xf32>
    %c0_3 = arith.constant 0 : index
    %c0_4 = arith.constant 0 : index
    %5 = vector.load %arg3[%c0_3, %c0_4] : memref<1x28xf32, #tpu.memory_space<vmem>>, vector<1x28xf32>
    %6 = vector.broadcast %5 : vector<1x28xf32> to vector<2x28xf32>
    %7 = arith.addf %4, %6 : vector<2x28xf32>
    %cst_5 = arith.constant 0.000000e+00 : f32
    %8 = vector.broadcast %cst_5 : f32 to vector<2x28xf32>
    %9 = arith.maximumf %7, %8 : vector<2x28xf32>
    %c0_6 = arith.constant 0 : index
    %c0_7 = arith.constant 0 : index
    %10 = vector.load %arg4[%c0_6, %c0_7] : memref<28x10xf32, #tpu.memory_space<vmem>>, vector<28x10xf32>
    %cst_8 = arith.constant dense<0.000000e+00> : vector<2x10xf32>
    %11 = tpu.matmul %9, %10, %cst_8 {dimension_numbers = #tpu.dot_dimension_numbers<[1], [0], [0], [1], [0, 0, 1, 1], [], []>} : vector<2x28xf32>, vector<28x10xf32>, vector<2x10xf32> -> vector<2x10xf32>
    %c0_9 = arith.constant 0 : index
    %c0_10 = arith.constant 0 : index
    %12 = vector.load %arg5[%c0_9, %c0_10] : memref<1x10xf32, #tpu.memory_space<vmem>>, vector<1x10xf32>
    %13 = vector.broadcast %12 : vector<1x10xf32> to vector<2x10xf32>
    %14 = arith.addf %11, %13 : vector<2x10xf32>
    %cst_11 = arith.constant dense<0xFF800000> : vector<2xf32>
    %15 = vector.multi_reduction <maximumf>, %14, %cst_11 [1] : vector<2x10xf32> to vector<2xf32>
    %16 = vector.shape_cast %15 : vector<2xf32> to vector<2x1xf32>
    %17 = vector.broadcast %16 : vector<2x1xf32> to vector<2x10xf32>
    %18 = arith.subf %14, %17 : vector<2x10xf32>
    %19 = math.exp %18 : vector<2x10xf32>
    %cst_12 = arith.constant dense<0.000000e+00> : vector<2xf32>
    %20 = vector.multi_reduction <add>, %19, %cst_12 [1] : vector<2x10xf32> to vector<2xf32>
    %21 = vector.shape_cast %20 : vector<2xf32> to vector<2x1xf32>
    %22 = math.log %21 : vector<2x1xf32>
    %23 = vector.broadcast %22 : vector<2x1xf32> to vector<2x10xf32>
    %24 = arith.subf %18, %23 : vector<2x10xf32>
    %c0_13 = arith.constant 0 : index
    %c0_14 = arith.constant 0 : index
    %25 = vector.load %arg6[%c0_13, %c0_14] : memref<2x10xf32, #tpu.memory_space<vmem>>, vector<2x10xf32>
    tpu.vector_store %arg6[%c0_13, %c0_14], %24 {strides = array<i32>} : memref<2x10xf32, #tpu.memory_space<vmem>>, vector<2x10xf32>,
    return
  }
  func.func @transform_0(%arg0: i32) -> (i32, i32) {
    %c0_i32 = arith.constant 0 : i32
    %c0_i32_0 = arith.constant 0 : i32
    return %arg0, %c0_i32 : i32, i32
  }
  func.func @transform_1(%arg0: i32) -> (i32, i32) {
    %c0_i32 = arith.constant 0 : i32
    %c0_i32_0 = arith.constant 0 : i32
    %c0_i32_1 = arith.constant 0 : i32
    return %c0_i32, %c0_i32_0 : i32, i32
  }
  func.func @transform_2(%arg0: i32) -> (i32, i32) {
    %c0_i32 = arith.constant 0 : i32
    %c0_i32_0 = arith.constant 0 : i32
    %c0_i32_1 = arith.constant 0 : i32
    return %c0_i32, %c0_i32_0 : i32, i32
  }
  func.func @transform_3(%arg0: i32) -> (i32, i32) {
    %c0_i32 = arith.constant 0 : i32
    %c0_i32_0 = arith.constant 0 : i32
    %c0_i32_1 = arith.constant 0 : i32
    return %c0_i32, %c0_i32_0 : i32, i32
  }
  func.func @transform_4(%arg0: i32) -> (i32, i32) {
    %c0_i32 = arith.constant 0 : i32
    %c0_i32_0 = arith.constant 0 : i32
    %c0_i32_1 = arith.constant 0 : i32
    return %c0_i32, %c0_i32_0 : i32, i32
  }
  func.func @transform_5(%arg0: i32) -> (i32, i32) {
    %c0_i32 = arith.constant 0 : i32
    %c0_i32_0 = arith.constant 0 : i32
    return %arg0, %c0_i32 : i32, i32
  }
}

</mosaic_0001>

<bundles_post_ra>
// kernel: tpu_custom_call.1
= control target key start
LH: loop header
LB: loop body
LE: loop exit
PB: predicated region body
PF: predicated region fallthrough
CT: control target
= control target key end

     0   :  { %v647_v43 = vmov 1983009808   ;;  %v30_v45 = vlaneseq  ;;  %s1030_s0 = inlined_call_operand.vmem [shape: f32[2,784], index: 0, kind: input, shape index: {}]   ;;  %s1031_s1 = inlined_call_operand.vmem [shape: f32[784,28], index: 1, kind: input, shape index: {}]   ;;  %s1032_s2 = inlined_call_operand.vmem [shape: f32[1,28], index: 2, kind: input, shape index: {}]   ;;  %s1033_s3 = inlined_call_operand.vmem [shape: f32[28,10], index: 3, kind: input, shape index: {}]   ;;  %s1034_s4 = inlined_call_operand.vmem [shape: f32[1,10], index: 4, kind: input, shape index: {}]   ;;  %s1035_s5 = inlined_call_operand.hbm [shape: f32[2,10], index: 5, kind: output, shape index: {}]  }
   0x1   :  { %v89_v0 = vld [vmem:[%s1031_s1 + $0x80] sm:$0xff]  ;;  %v90_v1 = vld [vmem:[%s1031_s1 + $0x88] sm:$0xff]  ;;  %v91_v11 = vld [vmem:[%s1031_s1 + $0x90] sm:$0xff]  ;;  %v28_v44 = vunpack.c.l.s4 %v647_v43 }
   0x2   :  { %v73_v2 = vld [vmem:[%s1031_s1] sm:$0xff]  ;;  %v179_v3 = vpack.c.bf16 %v90_v1, %v89_v0  ;;  %v74_v4 = vld [vmem:[%s1031_s1 + $0x8] sm:$0xff]  ;;  %v92_v13 = vld [vmem:[%s1031_s1 + $0x98] sm:$0xff]  ;;  %v31_v60 = vshrl.u32 %v30_v45, 7 }
   0x3   :  { %v121_v5 = vld [vmem:[%s1031_s1 + $0x180] sm:$0xff]  ;;  %v122_v6 = vld [vmem:[%s1031_s1 + $0x188] sm:$0xff]  ;;  %v171_v7 = vpack.c.bf16 %v74_v4, %v73_v2  ;;  %v75_v14 = vld [vmem:[%s1031_s1 + $0x10] sm:$0xff]  ;;  %v180_v16 = vpack.c.bf16 %v92_v13, %v91_v11  ;;  %v29_v59 = vunpack.c.0.s8 %v28_v44 }
   0x4   :  { %v195_v8 = vpack.c.bf16 %v122_v6, %v121_v5  ;;  %v105_v9 = vld [vmem:[%s1031_s1 + $0x100] sm:$0xff]  ;;  %v106_v10 = vld [vmem:[%s1031_s1 + $0x108] sm:$0xff]  ;;  %514 = vmatprep.subr.bf16.mxu0 %v179_v3  ;;  %v76_v15 = vld [vmem:[%s1031_s1 + $0x18] sm:$0xff] }
   0x5   :  { %v187_v12 = vpack.c.bf16 %v106_v10, %v105_v9  ;;  %515 = vmatpush3.bf16.msra.mxu0 %v171_v7  ;;  %v172_v17 = vpack.c.bf16 %v76_v15, %v75_v14  ;;  %v123_v18 = vld [vmem:[%s1031_s1 + $0x190] sm:$0xff]  ;;  %v124_v19 = vld [vmem:[%s1031_s1 + $0x198] sm:$0xff]  ;;  %v93_v23 = vld [vmem:[%s1031_s1 + $0xa0] sm:$0xff]  ;;  %v827_v10 = vsub.s32 %v29_v59, %v31_v60 }
   0x6   :  { %536 = vmatprep.subr.bf16.mxu1 %v195_v8  ;;  %v107_v20 = vld [vmem:[%s1031_s1 + $0x110] sm:$0xff]  ;;  %v196_v21 = vpack.c.bf16 %v124_v19, %v123_v18  ;;  %v108_v22 = vld [vmem:[%s1031_s1 + $0x118] sm:$0xff]  ;;  %v94_v24 = vld [vmem:[%s1031_s1 + $0xa8] sm:$0xff]  ;;  %516 = vmatprep.subr.bf16.mxu0 %v180_v16 }
   0x7   :  { %537 = vmatpush3.bf16.msra.mxu1 %v187_v12  ;;  %v188_v25 = vpack.c.bf16 %v108_v22, %v107_v20  ;;  %v181_v26 = vpack.c.bf16 %v94_v24, %v93_v23  ;;  %v77_v27 = vld [vmem:[%s1031_s1 + $0x20] sm:$0xff]  ;;  %v78_v28 = vld [vmem:[%s1031_s1 + $0x28] sm:$0xff]  ;;  %v95_v35 = vld [vmem:[%s1031_s1 + $0xb0] sm:$0xff] }
   0x8   :  { %v125_v29 = vld [vmem:[%s1031_s1 + $0x1a0] sm:$0xff]  ;;  %538 = vmatprep.subr.bf16.mxu1 %v196_v21  ;;  %v126_v30 = vld [vmem:[%s1031_s1 + $0x1a8] sm:$0xff]  ;;  %v173_v33 = vpack.c.bf16 %v78_v28, %v77_v27  ;;  %v96_v36 = vld [vmem:[%s1031_s1 + $0xb8] sm:$0xff] }
   0x9   :  { %v109_v31 = vld [vmem:[%s1031_s1 + $0x120] sm:$0xff]  ;;  %v110_v32 = vld [vmem:[%s1031_s1 + $0x128] sm:$0xff]  ;;  %517 = vmatpush3.bf16.msra.mxu0 %v172_v17  ;;  %v197_v34 = vpack.c.bf16 %v126_v30, %v125_v29  ;;  %v79_v37 = vld [vmem:[%s1031_s1 + $0x30] sm:$0xff]  ;;  %v182_v39 = vpack.c.bf16 %v96_v36, %v95_v35 }
   0xa   :  { %518 = vmatprep.subr.bf16.mxu0 %v181_v26  ;;  %v189_v38 = vpack.c.bf16 %v110_v32, %v109_v31  ;;  %v80_v40 = vld [vmem:[%s1031_s1 + $0x38] sm:$0xff]  ;;  %v127_v41 = vld [vmem:[%s1031_s1 + $0x1b0] sm:$0xff]  ;;  %v97_v49 = vld [vmem:[%s1031_s1 + $0xc0] sm:$0xff] }
   0xb   :  { %539 = vmatpush3.bf16.msra.mxu1 %v188_v25  ;;  %v128_v42 = vld [vmem:[%s1031_s1 + $0x1b8] sm:$0xff]  ;;  %v111_v47 = vld [vmem:[%s1031_s1 + $0x130] sm:$0xff]  ;;  %v98_v50 = vld [vmem:[%s1031_s1 + $0xc8] sm:$0xff]  ;;  %v174_v51 = vpack.c.bf16 %v80_v40, %v79_v37 }
   0xc   :  { %540 = vmatprep.subr.bf16.mxu1 %v197_v34  ;;  %v198_v46 = vpack.c.bf16 %v128_v42, %v127_v41  ;;  %v112_v48 = vld [vmem:[%s1031_s1 + $0x138] sm:$0xff]  ;;  %v129_v52 = vld [vmem:[%s1031_s1 + $0x1c0] sm:$0xff]  ;;  %v130_v53 = vld [vmem:[%s1031_s1 + $0x1c8] sm:$0xff]  ;;  %v183_v55 = vpack.c.bf16 %v98_v50, %v97_v49 }
   0xd   :  { %519 = vmatpush3.bf16.msra.mxu0 %v173_v33  ;;  %v190_v54 = vpack.c.bf16 %v112_v48, %v111_v47  ;;  %v81_v56 = vld [vmem:[%s1031_s1 + $0x40] sm:$0xff]  ;;  %v82_v57 = vld [vmem:[%s1031_s1 + $0x48] sm:$0xff]  ;;  %v199_v61 = vpack.c.bf16 %v130_v53, %v129_v52  ;;  %v99_v63 = vld [vmem:[%s1031_s1 + $0xd0] sm:$0xff] }
   0xe   :  { %520 = vmatprep.subr.bf16.mxu0 %v182_v39  ;;  %v113_v58 = vld [vmem:[%s1031_s1 + $0x140] sm:$0xff]  ;;  %v114_v62 = vld [vmem:[%s1031_s1 + $0x148] sm:$0xff]  ;;  %v100_v0 = vld [vmem:[%s1031_s1 + $0xd8] sm:$0xff]  ;;  %v175_v3 = vpack.c.bf16 %v82_v57, %v81_v56 }
   0xf   :  { %541 = vmatpush3.bf16.msra.mxu1 %v189_v38  ;;  %v131_v1 = vld [vmem:[%s1031_s1 + $0x1d0] sm:$0xff]  ;;  %v132_v2 = vld [vmem:[%s1031_s1 + $0x1d8] sm:$0xff]  ;;  %v191_v5 = vpack.c.bf16 %v114_v62, %v113_v58  ;;  %v184_v6 = vpack.c.bf16 %v100_v0, %v99_v63  ;;  %v101_v12 = vld [vmem:[%s1031_s1 + $0xe0] sm:$0xff] }
  0x10   :  { %542 = vmatprep.subr.bf16.mxu1 %v198_v46  ;;  %v83_v4 = vld [vmem:[%s1031_s1 + $0x50] sm:$0xff]  ;;  %v84_v7 = vld [vmem:[%s1031_s1 + $0x58] sm:$0xff]  ;;  %v200_v11 = vpack.c.bf16 %v132_v2, %v131_v1  ;;  %v102_v13 = vld [vmem:[%s1031_s1 + $0xe8] sm:$0xff] }
  0x11   :  { %521 = vmatpush3.bf16.msra.mxu0 %v174_v51  ;;  %v115_v8 = vld [vmem:[%s1031_s1 + $0x150] sm:$0xff]  ;;  %v116_v9 = vld [vmem:[%s1031_s1 + $0x158] sm:$0xff]  ;;  %v133_v14 = vld [vmem:[%s1031_s1 + $0x1e0] sm:$0xff]  ;;  %v176_v16 = vpack.c.bf16 %v84_v7, %v83_v4  ;;  %v185_v20 = vpack.c.bf16 %v102_v13, %v101_v12 }
  0x12   :  { %522 = vmatprep.subr.bf16.mxu0 %v183_v55  ;;  %v134_v15 = vld [vmem:[%s1031_s1 + $0x1e8] sm:$0xff]  ;;  %v192_v17 = vpack.c.bf16 %v116_v9, %v115_v8  ;;  %v85_v18 = vld [vmem:[%s1031_s1 + $0x60] sm:$0xff]  ;;  %v103_v27 = vld [vmem:[%s1031_s1 + $0xf0] sm:$0xff] }
  0x13   :  { %543 = vmatpush3.bf16.msra.mxu1 %v190_v54  ;;  %v22_v19 = vld [vmem:[%s1030_s0] sm:$0xff]  ;;  %v86_v21 = vld [vmem:[%s1031_s1 + $0x68] sm:$0xff]  ;;  %v201_v26 = vpack.c.bf16 %v134_v15, %v133_v14  ;;  %v104_v28 = vld [vmem:[%s1031_s1 + $0xf8] sm:$0xff] }
  0x14   :  { %544 = vmatprep.subr.bf16.mxu1 %v199_v61  ;;  %v117_v22 = vld [vmem:[%s1031_s1 + $0x160] sm:$0xff]  ;;  %v118_v23 = vld [vmem:[%s1031_s1 + $0x168] sm:$0xff]  ;;  %v33_v24 = vrot.slane %v22_v19, %v827_v10  ;;  %v26_v25 = vcombine.high %v22_v19, %v22_v19  ;;  %v135_v29 = vld [vmem:[%s1031_s1 + $0x1f0] sm:$0xff]  ;;  %v177_v33 = vpack.c.bf16 %v86_v21, %v85_v18  ;;  %v186_v35 = vpack.c.bf16 %v104_v28, %v103_v27 }
  0x15   :  { %523 = vmatpush3.bf16.msra.mxu0 %v175_v3  ;;  %v136_v30 = vld [vmem:[%s1031_s1 + $0x1f8] sm:$0xff]  ;;  %v193_v34 = vpack.c.bf16 %v118_v23, %v117_v22  ;;  %v87_v36 = vld [vmem:[%s1031_s1 + $0x70] sm:$0xff]  ;;  %v153_v43 = vld [vmem:[%s1031_s1 + $0x280] sm:$0xff] }
  0x16   :  { %524 = vmatprep.subr.bf16.mxu0 %v184_v6  ;;  %v41_v31 = vcombine.high %v33_v24, %v33_v24  ;;  %v40_v32 = vrot.slane %v26_v25, %v827_v10  ;;  %v88_v37 = vld [vmem:[%s1031_s1 + $0x78] sm:$0xff]  ;;  %v119_v39 = vld [vmem:[%s1031_s1 + $0x170] sm:$0xff]  ;;  %v202_v41 = vpack.c.bf16 %v136_v30, %v135_v29  ;;  %v154_v44 = vld [vmem:[%s1031_s1 + $0x288] sm:$0xff]  ;;  %v66_v53 = vpack.c.bf16 %v33_v24, %v33_v24 }
  0x17   :  { %545 = vmatpush3.bf16.msra.mxu1 %v191_v5  ;;  %v120_v42 = vld [vmem:[%s1031_s1 + $0x178] sm:$0xff]  ;;  %v178_v46 = vpack.c.bf16 %v88_v37, %v87_v36  ;;  %v211_v48 = vpack.c.bf16 %v154_v44, %v153_v43  ;;  %v137_v49 = vld [vmem:[%s1031_s1 + $0x200] sm:$0xff]  ;;  %v138_v50 = vld [vmem:[%s1031_s1 + $0x208] sm:$0xff] }
  0x18   :  { %546 = vmatprep.subr.bf16.mxu1 %v200_v11  ;;  %v67_v38 = vpack.c.bf16 %v41_v31, %v41_v31  ;;  %v42_v40 = vcombine.high %v40_v32, %v40_v32  ;;  %v194_v47 = vpack.c.bf16 %v120_v42, %v119_v39  ;;  %v155_v51 = vld [vmem:[%s1031_s1 + $0x290] sm:$0xff]  ;;  %v156_v52 = vld [vmem:[%s1031_s1 + $0x298] sm:$0xff]  ;;  %v203_v54 = vpack.c.bf16 %v138_v50, %v137_v49  ;;  %v169_v57 = vld [vmem:[%s1031_s1 + $0x300] sm:$0xff] }
  0x19   :  { %525 = vmatpush3.bf16.msra.mxu0 %v176_v16  ;;  %v68_v55 = vpack.c.bf16 %v40_v32, %v40_v32  ;;  %v139_v56 = vld [vmem:[%s1031_s1 + $0x210] sm:$0xff]  ;;  %v170_v58 = vld [vmem:[%s1031_s1 + $0x308] sm:$0xff]  ;;  %v212_v59 = vpack.c.bf16 %v156_v52, %v155_v51  ;;  %v140_v60 = vld [vmem:[%s1031_s1 + $0x218] sm:$0xff] }
  0x1a   :  { %526 = vmatprep.subr.bf16.mxu0 %v185_v20  ;;  %263 = vmatprep.mubr.bf16.mxu0 %v67_v38  ;;  %v69_v45 = vpack.c.bf16 %v42_v40, %v42_v40  ;;  %v219_v61 = vpack.c.bf16 %v170_v58, %v169_v57  ;;  %v23_v62 = vld [vmem:[%s1030_s0 + $0x8] sm:$0x3f] }
  0x1b   :  { %547 = vmatpush3.bf16.msra.mxu1 %v192_v17 }
  0x1c   :  { %548 = vmatprep.subr.bf16.mxu1 %v201_v26  ;;  %303 = vmatprep.mubr.bf16.mxu1 %v69_v45 }
  0x1d   :  { %527 = vmatpush3.bf16.msra.mxu0 %v177_v33 }
  0x1e   :  { %528 = vmatprep.subr.bf16.mxu0 %v186_v35 }
  0x1f   :  { %549 = vmatpush3.bf16.msra.mxu1 %v193_v34 }
  0x20   :  { %550 = vmatprep.subr.bf16.mxu1 %v202_v41 }
  0x21   :  { %529 = vmatpush3.bf16.msra.mxu0 %v178_v46 }
  0x22   :  { %558 = vmatprep.subr.bf16.mxu0 %v211_v48 }
  0x23   :  { %551 = vmatpush3.bf16.msra.mxu1 %v194_v47 }
  0x24   :  { %10 = vsyncpa [#allocation3], 0  ;;  %v157_v63 = vld [vmem:[%s1031_s1 + $0x2a0] sm:$0xff]  ;;  %v158_v0 = vld [vmem:[%s1031_s1 + $0x2a8] sm:$0xff]  ;;  %v648_v1 = vmov 0.0   ;;  %v43_v2 = vcombine.high %v23_v62, %v23_v62  ;;  %v922_v3 = vrot.slane %v23_v62, %v827_v10  ;;  %264 = vmatmul.mubr.bf16.vlgmr.msra.gmra.mrb[0].mxu0 %v66_v53  ;;  %v204_v4 = vpack.c.bf16 %v140_v60, %v139_v56  ;;  %s652_s24 = smov [#allocation2]  }
  0x25   :  { %587 = vmatprep.subr.bf16.mxu1 %v648_v1  ;;  %559 = vmatpush3.bf16.msra.mxu0 %v203_v54  ;;  %v213_v7 = vpack.c.bf16 %v158_v0, %v157_v63  ;;  %v141_v8 = vld [vmem:[%s1031_s1 + $0x220] sm:$0xff]  ;;  %v142_v9 = vld [vmem:[%s1031_s1 + $0x228] sm:$0xff]  ;;  %v159_v11 = vld [vmem:[%s1031_s1 + $0x2b0] sm:$0xff]  ;;  %vm649_vm0 = vmmov 0   ;;  %vm227_vm1 = vcmask 130048   ;;  %v650_v47 = vmov 0.0|0.0  }
  0x26   :  { %304 = vmatmul.mubr.bf16.vlgmr.msra.gmra.mrb[0].mxu1 %v68_v55  ;;  %v57_v5 = vrot.slane %v43_v2, %v827_v10  ;;  %v58_v6 = vcombine.high %v922_v3, %v922_v3  ;;  %560 = vmatprep.subr.bf16.mxu0 %v212_v59  ;;  %v160_v10 = vld [vmem:[%s1031_s1 + $0x2b8] sm:$0xff]  ;;  %v205_v13 = vpack.c.bf16 %v142_v9, %v141_v8  ;;  %v143_v16 = vld [vmem:[%s1031_s1 + $0x230] sm:$0xff]  ;;  %v161_v18 = vld [vmem:[%s1031_s1 + $0x2c0] sm:$0xff]  ;;  %vm407_vm2 = vcmask 1043456  }
  0x27   :  { %588 = vmatpush3.bf16.msra.mxu1 %v219_v61  ;;  %589 = vmatprep.mubr.msk.bf16.mxu1 %vm649_vm0, %v648_v1  ;;  %v214_v15 = vpack.c.bf16 %v160_v10, %v159_v11  ;;  %v144_v17 = vld [vmem:[%s1031_s1 + $0x238] sm:$0xff]  ;;  %v162_v19 = vld [vmem:[%s1031_s1 + $0x2c8] sm:$0xff]  ;;  %v145_v22 = vld [vmem:[%s1031_s1 + $0x240] sm:$0xff]  ;;  %v70_v43 = vpack.c.bf16 %v922_v3, %v922_v3  ;;  %vm651_vm3 = vmmov 1   ;;  %vm403_vm5 = vcmask 228352  }
  0x28   :  { %v71_v12 = vpack.c.bf16 %v58_v6, %v58_v6  ;;  %v72_v14 = vpack.c.bf16 %v57_v5, %v57_v5  ;;  %v206_v20 = vpack.c.bf16 %v144_v17, %v143_v16  ;;  %v215_v21 = vpack.c.bf16 %v162_v19, %v161_v18  ;;  %v146_v23 = vld [vmem:[%s1031_s1 + $0x248] sm:$0xff]  ;;  %v163_v24 = vld [vmem:[%s1031_s1 + $0x2d0] sm:$0xff]  ;;  %v164_v25 = vld [vmem:[%s1031_s1 + $0x2d8] sm:$0xff]  ;;  %604 = vmatprep.subr.bf16.mxu1 %v650_v47 }
  0x29   :  { %561 = vmatpush3.bf16.msra.mxu0 %v204_v4  ;;  %v207_v26 = vpack.c.bf16 %v146_v23, %v145_v22  ;;  %v216_v27 = vpack.c.bf16 %v164_v25, %v163_v24  ;;  %v147_v28 = vld [vmem:[%s1031_s1 + $0x250] sm:$0xff]  ;;  %v148_v29 = vld [vmem:[%s1031_s1 + $0x258] sm:$0xff]  ;;  %v165_v30 = vld [vmem:[%s1031_s1 + $0x2e0] sm:$0xff]  ;;  %vm481_vm6 = vcmask 74752  }
  0x2a   :  { %343 = vmatprep.mubr.bf16.mxu0 %v71_v12  ;;  %562 = vmatprep.subr.bf16.mxu0 %v213_v7  ;;  %v166_v31 = vld [vmem:[%s1031_s1 + $0x2e8] sm:$0xff]  ;;  %v208_v32 = vpack.c.bf16 %v148_v29, %v147_v28  ;;  %v149_v34 = vld [vmem:[%s1031_s1 + $0x260] sm:$0xff]  ;;  %v167_v36 = vld [vmem:[%s1031_s1 + $0x2f0] sm:$0xff] }
  0x2b   :  { %v217_v33 = vpack.c.bf16 %v166_v31, %v165_v30  ;;  %v150_v35 = vld [vmem:[%s1031_s1 + $0x268] sm:$0xff]  ;;  %v168_v37 = vld [vmem:[%s1031_s1 + $0x2f8] sm:$0xff]  ;;  %v151_v40 = vld [vmem:[%s1031_s1 + $0x270] sm:$0xff] }
  0x2c   :  { %v209_v38 = vpack.c.bf16 %v150_v35, %v149_v34  ;;  %v218_v39 = vpack.c.bf16 %v168_v37, %v167_v36  ;;  %v152_v41 = vld [vmem:[%s1031_s1 + $0x278] sm:$0xff]  ;;  %v392_v44 = vld [vmem:[%s1033_s3] sm:$0xff]  ;;  %v393_v45 = vld [vmem:[%s1033_s3 + $0x8] sm:$0xff] }
  0x2d   :  { %563 = vmatpush3.bf16.msra.mxu0 %v205_v13  ;;  %v210_v42 = vpack.c.bf16 %v152_v41, %v151_v40  ;;  %v605_v46 = vpack.c.bf16 %v393_v45, %v392_v44  ;;  %v394_v48 = vld [vmem:[%s1033_s3 + $0x10] sm:$0xff]  ;;  %v395_v49 = vld [vmem:[%s1033_s3 + $0x18] sm:$0xf]  ;;  %vm609_vm4 = vmpackc.low %vm407_vm2, %vm651_vm3 }
  0x2e   :  { %590 = vmatmul.mubr.msk.bf16.vlgmr.msra.gmra.mrb[4].mxu1 %vm227_vm1, %v72_v14  ;;  %564 = vmatprep.subr.bf16.mxu0 %v214_v15  ;;  %v608_v50 = vpack.c.bf16 %v395_v49, %v394_v48  ;;  %v509_v52 = vld [vmem:[%s1032_s2] ss:$0 sm:$0xff] }
  0x2f   :  { %601 = vmatprep.mubr.msk.f32.mxu1 %vm649_vm0, %v648_v1  ;;  %606 = vmatpush3.bf16.msra.mxu1 %v605_v46  ;;  %v511_v12 = vld [vmem:[%s1034_s4] ss:$0 sm:$0xff]  ;;  %s501_s4 = sshll.u32 %s652_s24, 4  ;;  %s502_s4 = int_to_ptr.vmem [resolvable:$true] %s501_s4 }
  0x30   :  { %607 = vmatprep.subr.bf16.mxu1 %v650_v47  ;;  %s623_s25 = scalar_lea.vmem %s502_s4, 32  ;;  %p628_p1 = scmp.lt.s32.totalorder %s502_s4, %s502_s4 }
  0x31   :  { %565 = vmatpush3.bf16.msra.mxu0 %v206_v20  ;;  %p624_p0 = scmp.ne.s32.totalorder %s502_s4, %s623_s25  ;;  %p629_p2 = scmp.lt.s32.totalorder %s623_s25, %s623_s25 }
  0x32   :  { %566 = vmatprep.subr.bf16.mxu0 %v215_v21 }
  0x33   :  { %610 = vmatpush3.bf16.msk.msra.mxu1 %vm609_vm4, %v608_v50  ;;  %p630_p3 = por %p629_p2, %p628_p1 }
  0x35   :  { %567 = vmatpush3.bf16.msra.mxu0 %v207_v26  ;;  %p631_p4 = pnand %p630_p3, %p624_p0 }
  0x36   :  { %568 = vmatprep.subr.bf16.mxu0 %v216_v27 }
  0x39   :  { %569 = vmatpush3.bf16.msra.mxu0 %v208_v32 }
  0x3a   :  { %570 = vmatprep.subr.bf16.mxu0 %v217_v33 }
  0x3d   :  { %571 = vmatpush3.bf16.msra.mxu0 %v209_v38 }
  0x3e   :  { %572 = vmatprep.subr.bf16.mxu0 %v218_v39 }
  0x41   :  { %573 = vmatpush3.bf16.msra.mxu0 %v210_v42 }
  0x44   :  { %344 = vmatmul.mubr.bf16.vlgmr.msra.gmra.mrb[4].mxu0 %v70_v43 }
  0xf7   :  { %v530_v51 = vpop.f32.mrb[0].mxu0 }
  0xf8   :  { %v531_v53 = vpop.f32.mrb[1].mxu0 }
  0xf9   :  { %v552_v54 = vpop.f32.mrb[0].mxu1  ;;  %v532_v55 = vadd.f32 %v531_v53, %v530_v51  ;;  %v533_v56 = vpop.f32.mrb[2].mxu0 }
  0xfa   :  { %v553_v57 = vpop.f32.mrb[1].mxu1  ;;  %v534_v58 = vpop.f32.mrb[3].mxu0 }
  0xfb   :  { %v554_v59 = vadd.f32 %v553_v57, %v552_v54  ;;  %v555_v60 = vpop.f32.mrb[2].mxu1  ;;  %v266_v61 = vadd.f32 %v532_v55, %v509_v52 }
  0xfc   :  { %v556_v62 = vpop.f32.mrb[3].mxu1 }
  0xfd   :  { %v306_v63 = vadd.f32 %v554_v59, %v266_v61 }
 0x101   :  { %v385_v0 = vpop.f32.mrb[4].mxu1 }
 0x102   :  { %v591_v1 = vpop.f32.mrb[5].mxu1 }
 0x103   :  { %v388_v2 = vpop.f32.mrb[6].mxu1 }
 0x104   :  { %v592_v3 = vpop.f32.mrb[7].mxu1 }
 0x117   :  { %v574_v4 = vpop.f32.mrb[4].mxu0 }
 0x118   :  { %v575_v5 = vpop.f32.mrb[5].mxu0 }
 0x119   :  { %v576_v6 = vadd.f32 %v575_v5, %v574_v4  ;;  %v577_v7 = vpop.f32.mrb[6].mxu0 }
 0x11a   :  { %v578_v8 = vpop.f32.mrb[7].mxu0 }
 0x11b   :  { %v346_v9 = vadd.f32 %v576_v6, %v306_v63 }
 0x11d   :  { %v386_v11 = vadd.f32 %v385_v0, %v346_v9 }
 0x11f   :  { %v391_v10 = vmax.f32 %v386_v11, 0.0 }
 0x121   :  { %602 = vmatmul.mubr.msk.f32.vlgmr.msra.gmra.mrb[8].mxu1 %vm403_vm5, %v391_v10 }
 0x1f4   :  { %v477_v13 = vpop.f32.mrb[8].mxu1 }
 0x1f5   :  { %v478_v14 = vadd.f32 %v511_v12, %v477_v13  ;;  %v603_v15 = vpop.f32.mrb[9].mxu1 }
 0x1f7   :  { %v482_v16 = vsel %vm481_vm6, %v478_v14, -inf }
 0x1f8   :  { %483 = vmax.xlane.f32.xlu0 %v482_v16 }
 0x285   :  { %v484_v17 = vpop.xlane.xlu0 %483 }
 0x286   :  { %v485_v18 = vsub.f32 %v478_v14, %v484_v17 }
 0x288   :  { %v486_v19 = vmul.f32 1.442695, %v485_v18 }
 0x28a   :  { %619 = vpow2.f32 %v486_v19 }
 0x294   :  { %v620_v20 = vpop.eup %619 }
 0x295   :  { %v488_v21 = vsel %vm481_vm6, %v620_v20, 0.0 }
 0x296   :  { %489 = vadd.xlane.f32.xlu0 %v488_v21 }
 0x323   :  { %v490_v22 = vpop.xlane.xlu0 %489 }
 0x324   :  { %621 = vlog2.f32 %v490_v22 }
 0x32e   :  { %v622_v23 = vpop.eup %621 }
 0x32f   :  { %v492_v24 = vmul.f32 0.6931472, %v622_v23 }
 0x331   :  { %v493_v25 = vsub.f32 %v485_v18, %v492_v24 }
 0x333   :  { %494 = vst.msk [vmem:[#allocation2] sm:$0x3] %vm481_vm6, %v493_v25 }
 0x334   :  { %634 = shalt.err (!%p631_p4)
}
 0x335   :  { %s635_s28 = scalar_lea.hbm %s1035_s5, 32 }
 0x336   :  { %p636_p5 = scmp.ne.s32.totalorder %s1035_s5, %s635_s28  ;;  %p639_p6 = scmp.lt.u32.totalorder %s635_s28, %s1035_s5 }
 0x338   :  { %p641_p7 = pnand %p639_p6, %p636_p5 }
 0x33a   :  { %644 = shalt.err (!%p641_p7)
}
 0x33b   :  { %504 = dma.vmem_to_hbm [thread:$0]  %s502_s4, 32, %s1035_s5, [#allocation3]  }
 0x33c   :  { %645 = dma.done.wait [#allocation3], 32  }
 0x33d   :  { %646 = vsyncadd [#allocation3], 4294967264 }
 0x33e   :  { %508 = vsyncpa [#allocation3], 1 }

</bundles_post_ra>
